<compile_context>
chip_gen: v6e
topology: v6e:2x2x1
jax: 0.10.0
libtpu: 0.0.40
codegen_flags: <defaults>
</compile_context>

<pallas_src>
import jax
import jax.numpy as jnp
from jax.experimental import pallas as pl
from jax.experimental.pallas import tpu as pltpu

NEG_SLOPE = 0.01  # PyTorch LeakyReLU default


def _leaky_relu(x):
    return jnp.where(x > 0, x, NEG_SLOPE * x)


def critic_kernel(x_ref, w1_ref, b1_ref, w2_ref, b2_ref, w3_ref, b3_ref, o_ref):
    # x:   (TB, D)  compute dtype      w1: (H, D)  torch layout    b1: (H, 1) f32
    # h1T: (H, TB)  f32 -> compute     w2: (H, H)  torch layout    b2: (H, 1) f32
    # h2T: (H, TB)  f32 -> compute     w3: (1, H)  torch layout    b3: (1, 1) f32
    # o:   (1, TB)  f32  lane-dense row (wrapper reshapes to (B, 1))
    x = x_ref[...]
    cdt = x.dtype

    # h1T = W1 @ x^T : contract the D (last) dims of (H,D) and (TB,D) -> (H,TB).
    # Same trans-B contraction pattern as q @ k^T; no operand transpose needed.
    h1t = jax.lax.dot_general(
        w1_ref[...], x,
        dimension_numbers=(((1,), (1,)), ((), ())),
        preferred_element_type=jnp.float32,
    ) + b1_ref[...]                       # (H,1) broadcasts along lanes
    h1t = _leaky_relu(h1t).astype(cdt)

    # h2T = W2 @ h1T : plain (H,H) @ (H,TB) -> (H,TB), lane-dense intermediate.
    h2t = jnp.dot(w2_ref[...], h1t, preferred_element_type=jnp.float32) + b2_ref[...]
    h2t = _leaky_relu(h2t).astype(cdt)

    # Final N=1 layer: (1,H) @ (H,TB) -> (1,TB).  Result already lane-major, so
    # the store is a dense (unmasked) vst and the output DMA writes contiguous lanes.
    out_row = jnp.dot(w3_ref[...], h2t, preferred_element_type=jnp.float32) + b3_ref[...]
    o_ref[...] = out_row.astype(o_ref.dtype)


def _choose_block_b(b_pad):
    """b_pad is a multiple of 128.  Prefer large lane-dense tiles (amortize the
    ~0.35us/step grid overhead) while keeping >=2 (ideally >=4) grid steps so the
    x stream pipelines and the batch axis can shard across v7x's 2 TensorCores.
    Candidates are 256-multiples (MXU width on v6e/v7x) down to 128."""
    candidates = (8192, 4096, 2048, 1024, 512, 256, 128)
    for min_steps in (4, 2):
        for cand in candidates:
            if b_pad % cand == 0 and b_pad // cand >= min_steps:
                return cand
    return b_pad  # b_pad == 128 (or otherwise unsplittable): single lane-dense block


def _vmem_capacity_bytes():
    try:
        return int(pltpu.get_tpu_info().vmem_capacity_bytes)
    except Exception:
        return 64 * 1024 * 1024  # assume the smallest (v7x per-TC) if query fails


def critic_forward(state, params, *, block_b=None, compute_dtype=jnp.float32):
    """state: (B, num_inputs). Returns (B, 1) float32.

    compute_dtype=jnp.bfloat16 halves HBM traffic on the x stream and the vreg
    footprint of the MXU operands; accumulation, biases and LeakyReLU stay f32.
    Default stays float32 to preserve the exact semantics of the torch module.
    """
    w1, b1, w2, b2, w3, b3 = params
    B, D = state.shape
    H = w1.shape[0]
    assert w1.shape == (H, D) and w2.shape == (H, H) and w3.shape == (1, H)

    # Pad ragged batches up to a lane-dense multiple of 128 so every B takes the
    # tiled / pipelined path; padded rows are computed and sliced away.
    B_pad = max(128, ((B + 127) // 128) * 128)

    if block_b is None:
        block_b = _choose_block_b(B_pad)
    assert B_pad % block_b == 0, (B_pad, block_b)
    assert block_b == B_pad or block_b % 128 == 0, block_b
    grid = (B_pad // block_b,)

    cdt = jnp.dtype(compute_dtype)
    x = state.astype(cdt)
    if B_pad != B:
        x = jnp.pad(x, ((0, B_pad - B), (0, 0)))
    w1c, w2c, w3c = (w.astype(cdt) for w in (w1, w2, w3))
    b1f, b2f, b3f = (b.astype(jnp.float32) for b in (b1, b2, b3))

    full2 = lambda i: (0, 0)  # whole-array block for grid-invariant weights/biases

    # Advisory cost estimate for XLA scheduling around the custom call.
    w_bytes = (H * D + H * H + H) * cdt.itemsize + (2 * H + 1) * 4
    cost = pl.CostEstimate(
        flops=2 * B_pad * (D * H + H * H + H),
        transcendentals=0,
        bytes_accessed=B_pad * D * cdt.itemsize + B_pad * 4 + w_bytes,
    )

    # VMEM working set per grid step: double-buffered x / out tiles, weights, and
    # the lane-dense (H, block_b) intermediates (f32 + compute-dtype copies).
    est = (2 * block_b * D * cdt.itemsize          # x tile, double buffered
           + 2 * block_b * 4                       # out row tile, double buffered
           + 2 * w_bytes                           # weight/bias blocks
           + 2 * H * block_b * 4                   # h1T/h2T f32 intermediates
           + 2 * H * block_b * cdt.itemsize)       # cdt copies feeding the MXU
    # Generation-aware scoped-VMEM limit: at most ~60% of physical capacity
    # (64 MiB/TC on v7x, 128 MiB on v5e/v6e); at least the 32 MiB default so the
    # largest tiles also work under v5e's 16 MiB default scoped limit.
    vmem_cap = _vmem_capacity_bytes()
    vmem_limit = int(min(max(2 * est + (4 << 20), 32 << 20), 0.6 * vmem_cap))
    # NOTE: grid-invariant weight/bias blocks could be marked pl.Buffered(1) to save
    # ~20-40 KiB of double buffering, and b3 could live in SMEM — both negligible
    # at these sizes, so skipped to keep the lowering path simple.

    out_row = pl.pallas_call(
        critic_kernel,
        out_shape=jax.ShapeDtypeStruct((1, B_pad), jnp.float32),
        grid_spec=pltpu.PrefetchScalarGridSpec(
            num_scalar_prefetch=0,
            grid=grid,
            in_specs=[
                pl.BlockSpec((block_b, D), lambda i: (i, 0)),  # x tile over batch
                pl.BlockSpec((H, D), full2),                   # w1 (torch layout)
                pl.BlockSpec((H, 1), full2),                   # b1 column
                pl.BlockSpec((H, H), full2),                   # w2 (torch layout)
                pl.BlockSpec((H, 1), full2),                   # b2 column
                pl.BlockSpec((1, H), full2),                   # w3 row
                pl.BlockSpec((1, 1), full2),                   # b3
            ],
            out_specs=pl.BlockSpec((1, block_b), lambda i: (0, i)),  # lane-dense row
        ),
        compiler_params=pltpu.CompilerParams(
            dimension_semantics=("parallel",),  # batch axis: pipeline + v7x 2-TC split
            vmem_limit_bytes=vmem_limit,
        ),
        cost_estimate=cost,
    )(x, w1c, b1f, w2c, b2f, w3c, b3f)

    return out_row.reshape(B_pad, 1)[:B]


def init_critic_params(key, num_inputs, hidden_size=64):
    """Deterministic init mimicking torch.nn.Linear default (uniform +-1/sqrt(fan_in)).
    Weights are kept in torch-native (out_features, in_features) layout; biases are
    stored as (out_features, 1) columns for the lane-broadcast bias add."""
    ks = jax.random.split(key, 6)

    def linear(kw, kb, fan_in, fan_out):
        bound = 1.0 / jnp.sqrt(fan_in)
        w = jax.random.uniform(kw, (fan_out, fan_in), jnp.float32, -bound, bound)
        b = jax.random.uniform(kb, (fan_out, 1), jnp.float32, -bound, bound)
        return w, b

    w1, b1 = linear(ks[0], ks[1], num_inputs, hidden_size)
    w2, b2 = linear(ks[2], ks[3], hidden_size, hidden_size)
    w3, b3 = linear(ks[4], ks[5], hidden_size, 1)
    return (w1, b1, w2, b2, w3, b3)


def critic_ref(state, params):
    """Pure-JAX reference for correctness check (torch semantics)."""
    w1, b1, w2, b2, w3, b3 = params
    h1 = _leaky_relu(state @ w1.T + b1.T)
    h2 = _leaky_relu(h1 @ w2.T + b2.T)
    return h2 @ w3.T + b3.T


if __name__ == "__main__":
    key = jax.random.PRNGKey(0)
    kp, kx = jax.random.split(key)

    num_inputs, hidden = 16, 64
    params = init_critic_params(kp, num_inputs, hidden)

    # 1) Tiny batch: padded to one 128-row lane-dense block.
    x_small = jax.random.normal(kx, (8, num_inputs), dtype=jnp.float32)
    out_small = jax.block_until_ready(critic_forward(x_small, params))
    ref_small = critic_ref(x_small, params)
    assert out_small.shape == (8, 1), out_small.shape
    assert jnp.allclose(out_small, ref_small, atol=1e-4, rtol=1e-4)

    # 2) Ragged batch: 200 -> padded to 256, block_b=128, grid=(2,).
    x_rag = jax.random.normal(kx, (200, num_inputs), dtype=jnp.float32)
    out_rag = jax.block_until_ready(critic_forward(x_rag, params))
    ref_rag = critic_ref(x_rag, params)
    assert out_rag.shape == (200, 1), out_rag.shape
    assert jnp.allclose(out_rag, ref_rag, atol=1e-4, rtol=1e-4)

    # 3) Larger batch: tiled, pipelined, batch-on-lanes path (block_b=128, grid=(4,)).
    x_big = jax.random.normal(kx, (512, num_inputs), dtype=jnp.float32)
    out_big = jax.block_until_ready(critic_forward(x_big, params))
    ref_big = critic_ref(x_big, params)
    assert out_big.shape == (512, 1), out_big.shape
    assert jnp.allclose(out_big, ref_big, atol=1e-4, rtol=1e-4)

    # 4) Opt-in bf16 fast path (halved HBM traffic on x); f32 accumulation, loose tol.
    out_bf16 = jax.block_until_ready(
        critic_forward(x_big, params, compute_dtype=jnp.bfloat16))
    assert out_bf16.shape == (512, 1), out_bf16.shape
    assert jnp.allclose(out_bf16, ref_big, atol=5e-2, rtol=5e-2)

    print("KERNEL_OK")
</pallas_src>

<mosaic_0001>
module attributes {stable_mosaic.version = 11 : i64} {
  func.func @critic_kernel(%arg0: i32, %arg1: memref<128x16xf32, #tpu.memory_space<vmem>>, %arg2: memref<64x16xf32, #tpu.memory_space<vmem>>, %arg3: memref<64x1xf32, #tpu.memory_space<vmem>>, %arg4: memref<64x64xf32, #tpu.memory_space<vmem>>, %arg5: memref<64x1xf32, #tpu.memory_space<vmem>>, %arg6: memref<1x64xf32, #tpu.memory_space<vmem>>, %arg7: memref<1x1xf32, #tpu.memory_space<vmem>>, %arg8: memref<1x128xf32, #tpu.memory_space<vmem>>) attributes {dimension_semantics = [#tpu.dimension_semantics<parallel>], iteration_bounds = array<i64: 1>, scalar_prefetch = 0 : i64, scratch_operands = 0 : i64, tpu.core_type = #tpu.core_type<tc>, window_params = [{transform_indices = @transform_0, window_bounds = array<i64: 128, 16>}, {pipeline_mode = #tpu.pipeline_mode<synchronous>, transform_indices = @transform_1, window_bounds = array<i64: 64, 16>}, {pipeline_mode = #tpu.pipeline_mode<synchronous>, transform_indices = @transform_2, window_bounds = array<i64: 64, 1>}, {pipeline_mode = #tpu.pipeline_mode<synchronous>, transform_indices = @transform_3, window_bounds = array<i64: 64, 64>}, {pipeline_mode = #tpu.pipeline_mode<synchronous>, transform_indices = @transform_4, window_bounds = array<i64: 64, 1>}, {pipeline_mode = #tpu.pipeline_mode<synchronous>, transform_indices = @transform_5, window_bounds = array<i64: 1, 64>}, {pipeline_mode = #tpu.pipeline_mode<synchronous>, transform_indices = @transform_6, window_bounds = array<i64: 1, 1>}, {transform_indices = @transform_7, window_bounds = array<i64: 1, 128>}]} {
    %c0 = arith.constant 0 : index
    %c0_0 = arith.constant 0 : index
    %0 = vector.load %arg1[%c0, %c0_0] : memref<128x16xf32, #tpu.memory_space<vmem>>, vector<128x16xf32>
    %c0_1 = arith.constant 0 : index
    %c0_2 = arith.constant 0 : index
    %1 = vector.load %arg2[%c0_1, %c0_2] : memref<64x16xf32, #tpu.memory_space<vmem>>, vector<64x16xf32>
    %cst = arith.constant dense<0.000000e+00> : vector<64x128xf32>
    %2 = tpu.matmul %1, %0, %cst {dimension_numbers = #tpu.dot_dimension_numbers<[1], [1], [0], [0], [0, 0, 1, 0], [], []>} : vector<64x16xf32>, vector<128x16xf32>, vector<64x128xf32> -> vector<64x128xf32>
    %c0_3 = arith.constant 0 : index
    %c0_4 = arith.constant 0 : index
    %3 = vector.load %arg3[%c0_3, %c0_4] : memref<64x1xf32, #tpu.memory_space<vmem>>, vector<64x1xf32>
    %4 = vector.broadcast %3 : vector<64x1xf32> to vector<64x128xf32>
    %5 = arith.addf %2, %4 : vector<64x128xf32>
    %cst_5 = arith.constant 0.000000e+00 : f32
    %6 = vector.broadcast %cst_5 : f32 to vector<64x128xf32>
    %7 = arith.cmpf ogt, %5, %6 : vector<64x128xf32>
    %cst_6 = arith.constant 0.00999999977 : f32
    %8 = vector.broadcast %cst_6 : f32 to vector<64x128xf32>
    %9 = arith.mulf %8, %5 : vector<64x128xf32>
    %10 = arith.select %7, %5, %9 : vector<64x128xi1>, vector<64x128xf32>
    %c0_7 = arith.constant 0 : index
    %c0_8 = arith.constant 0 : index
    %11 = vector.load %arg4[%c0_7, %c0_8] : memref<64x64xf32, #tpu.memory_space<vmem>>, vector<64x64xf32>
    %cst_9 = arith.constant dense<0.000000e+00> : vector<64x128xf32>
    %12 = tpu.matmul %11, %10, %cst_9 {dimension_numbers = #tpu.dot_dimension_numbers<[1], [0], [0], [1], [0, 0, 1, 1], [], []>} : vector<64x64xf32>, vector<64x128xf32>, vector<64x128xf32> -> vector<64x128xf32>
    %c0_10 = arith.constant 0 : index
    %c0_11 = arith.constant 0 : index
    %13 = vector.load %arg5[%c0_10, %c0_11] : memref<64x1xf32, #tpu.memory_space<vmem>>, vector<64x1xf32>
    %14 = vector.broadcast %13 : vector<64x1xf32> to vector<64x128xf32>
    %15 = arith.addf %12, %14 : vector<64x128xf32>
    %cst_12 = arith.constant 0.000000e+00 : f32
    %16 = vector.broadcast %cst_12 : f32 to vector<64x128xf32>
    %17 = arith.cmpf ogt, %15, %16 : vector<64x128xf32>
    %cst_13 = arith.constant 0.00999999977 : f32
    %18 = vector.broadcast %cst_13 : f32 to vector<64x128xf32>
    %19 = arith.mulf %18, %15 : vector<64x128xf32>
    %20 = arith.select %17, %15, %19 : vector<64x128xi1>, vector<64x128xf32>
    %c0_14 = arith.constant 0 : index
    %c0_15 = arith.constant 0 : index
    %21 = vector.load %arg6[%c0_14, %c0_15] : memref<1x64xf32, #tpu.memory_space<vmem>>, vector<1x64xf32>
    %cst_16 = arith.constant dense<0.000000e+00> : vector<1x128xf32>
    %22 = tpu.matmul %21, %20, %cst_16 {dimension_numbers = #tpu.dot_dimension_numbers<[1], [0], [0], [1], [0, 0, 1, 1], [], []>} : vector<1x64xf32>, vector<64x128xf32>, vector<1x128xf32> -> vector<1x128xf32>
    %c0_17 = arith.constant 0 : index
    %c0_18 = arith.constant 0 : index
    %23 = vector.load %arg7[%c0_17, %c0_18] : memref<1x1xf32, #tpu.memory_space<vmem>>, vector<1x1xf32>
    %24 = vector.broadcast %23 : vector<1x1xf32> to vector<1x128xf32>
    %25 = arith.addf %22, %24 : vector<1x128xf32>
    %c0_19 = arith.constant 0 : index
    %c0_20 = arith.constant 0 : index
    %26 = vector.load %arg8[%c0_19, %c0_20] : memref<1x128xf32, #tpu.memory_space<vmem>>, vector<1x128xf32>
    tpu.vector_store %arg8[%c0_19, %c0_20], %25 {strides = array<i32>} : memref<1x128xf32, #tpu.memory_space<vmem>>, vector<1x128xf32>,
    return
  }
  func.func @transform_0(%arg0: i32) -> (i32, i32) {
    %c0_i32 = arith.constant 0 : i32
    %c0_i32_0 = arith.constant 0 : i32
    return %arg0, %c0_i32 : i32, i32
  }
  func.func @transform_1(%arg0: i32) -> (i32, i32) {
    %c0_i32 = arith.constant 0 : i32
    %c0_i32_0 = arith.constant 0 : i32
    %c0_i32_1 = arith.constant 0 : i32
    return %c0_i32, %c0_i32_0 : i32, i32
  }
  func.func @transform_2(%arg0: i32) -> (i32, i32) {
    %c0_i32 = arith.constant 0 : i32
    %c0_i32_0 = arith.constant 0 : i32
    %c0_i32_1 = arith.constant 0 : i32
    return %c0_i32, %c0_i32_0 : i32, i32
  }
  func.func @transform_3(%arg0: i32) -> (i32, i32) {
    %c0_i32 = arith.constant 0 : i32
    %c0_i32_0 = arith.constant 0 : i32
    %c0_i32_1 = arith.constant 0 : i32
    return %c0_i32, %c0_i32_0 : i32, i32
  }
  func.func @transform_4(%arg0: i32) -> (i32, i32) {
    %c0_i32 = arith.constant 0 : i32
    %c0_i32_0 = arith.constant 0 : i32
    %c0_i32_1 = arith.constant 0 : i32
    return %c0_i32, %c0_i32_0 : i32, i32
  }
  func.func @transform_5(%arg0: i32) -> (i32, i32) {
    %c0_i32 = arith.constant 0 : i32
    %c0_i32_0 = arith.constant 0 : i32
    %c0_i32_1 = arith.constant 0 : i32
    return %c0_i32, %c0_i32_0 : i32, i32
  }
  func.func @transform_6(%arg0: i32) -> (i32, i32) {
    %c0_i32 = arith.constant 0 : i32
    %c0_i32_0 = arith.constant 0 : i32
    %c0_i32_1 = arith.constant 0 : i32
    return %c0_i32, %c0_i32_0 : i32, i32
  }
  func.func @transform_7(%arg0: i32) -> (i32, i32) {
    %c0_i32 = arith.constant 0 : i32
    %c0_i32_0 = arith.constant 0 : i32
    return %c0_i32, %arg0 : i32, i32
  }
}

</mosaic_0001>

<bundles_post_ra>
// kernel: tpu_custom_call.1
= control target key start
LH: loop header
LB: loop body
LE: loop exit
PB: predicated region body
PF: predicated region fallthrough
CT: control target
= control target key end

     0   :  { %s1068_s0 = inlined_call_operand.vmem [shape: f32[128,16], index: 0, kind: input, shape index: {}]   ;;  %s1069_s1 = inlined_call_operand.vmem [shape: f32[64,16], index: 1, kind: input, shape index: {}]   ;;  %s1070_s2 = inlined_call_operand.vmem [shape: f32[64,1], index: 2, kind: input, shape index: {}]   ;;  %s1071_s3 = inlined_call_operand.vmem [shape: f32[64,64], index: 3, kind: input, shape index: {}]   ;;  %s1072_s4 = inlined_call_operand.vmem [shape: f32[64,1], index: 4, kind: input, shape index: {}]   ;;  %s1073_s5 = inlined_call_operand.vmem [shape: f32[1,64], index: 5, kind: input, shape index: {}]   ;;  %s1074_s6 = inlined_call_operand.<no memory space> [shape: f32[1,1], index: 6, kind: input, shape index: {}]   ;;  %s1075_s7 = inlined_call_operand.hbm [shape: f32[1,128], index: 7, kind: output, shape index: {}]  }
   0x1   :  { %v12_v0 = vstv %s1074_s6 }
   0x2   :  { %13 = vst [vmem:[#allocation2] sm:$0x1] %v12_v0 }
   0x3   :  { %v44_v1 = vld [vmem:[%s1068_s0 + $0x78] sm:$0xff]  ;;  %vm101_vm0 = vcmask 130048   ;;  %v43_v2 = vld [vmem:[%s1068_s0 + $0x70] sm:$0xff]  ;;  %v813_v3 = vmov 0   ;;  %v42_v4 = vld [vmem:[%s1068_s0 + $0x68] sm:$0xff] }
   0x4   :  { %694 = vmatprep.subr.msk.mxu0 %vm101_vm0, %v44_v1  ;;  %789 = vset.pattern.permute.xlu0 %v813_v3  ;;  %v45_v5 = vld [vmem:[%s1069_s1] sm:$0xff]  ;;  %v60_v7 = vld [vmem:[%s1070_s2 + $0x38] sm:$0xff]  ;;  %v58_v8 = vld [vmem:[%s1070_s2 + $0x28] sm:$0xff] }
   0x5   :  { %695 = vmatpush3.xpose.msk.msra.mxu0 %vm101_vm0, %v44_v1  ;;  %790 = vset.pattern.permute.xlu1 %v813_v3  ;;  %v41_v6 = vld [vmem:[%s1068_s0 + $0x60] sm:$0xff]  ;;  %v59_v9 = vld [vmem:[%s1070_s2 + $0x30] sm:$0xff]  ;;  %v40_v11 = vld [vmem:[%s1068_s0 + $0x58] sm:$0xff] }
   0x6   :  { %696 = vmatprep.subr.msk.mxu0 %vm101_vm0, %v43_v2  ;;  %726 = vmatprep.mubr.msk.f32.mxu0 %vm101_vm0, %v45_v5  ;;  %v57_v10 = vld [vmem:[%s1070_s2 + $0x20] sm:$0xff] }
   0x7   :  { %98 = vperm.xlu0 %789, %v60_v7   ;;  %88 = vperm.xlu1 %790, %v58_v8  }
   0x9   :  { %697 = vmatpush3.xpose.msk.msra.mxu0 %vm101_vm0, %v43_v2 }
   0xa   :  { %698 = vmatprep.subr.msk.mxu0 %vm101_vm0, %v42_v4 }
   0xb   :  { %93 = vperm.xlu0 %789, %v59_v9   ;;  %83 = vperm.xlu1 %790, %v57_v10  }
   0xd   :  { %699 = vmatpush3.xpose.msk.msra.mxu0 %vm101_vm0, %v42_v4 }
   0xe   :  { %700 = vmatprep.subr.msk.mxu0 %vm101_vm0, %v41_v6 }
   0xf   :  { %14 = vsyncpa [#allocation4], 0  ;;  %v56_v12 = vld [vmem:[%s1070_s2 + $0x18] sm:$0xff]  ;;  %v55_v13 = vld [vmem:[%s1070_s2 + $0x10] sm:$0xff]  ;;  %vm359_vm1 = vcmask 523264   ;;  %vm815_vm10 = vmmov 0  }
  0x10   :  { %v39_v14 = vld [vmem:[%s1068_s0 + $0x50] sm:$0xff]  ;;  %78 = vperm.xlu0 %789, %v56_v12   ;;  %73 = vperm.xlu1 %790, %v55_v13   ;;  %v54_v15 = vld [vmem:[%s1070_s2 + $0x8] sm:$0xff]  ;;  %v53_v16 = vld [vmem:[%s1070_s2] sm:$0xff]  ;;  %s816_s20 = smov [#allocation3]  }
  0x11   :  { %701 = vmatpush3.xpose.msk.msra.mxu0 %vm101_vm0, %v41_v6  ;;  %v38_v17 = vld [vmem:[%s1068_s0 + $0x48] sm:$0xff]  ;;  %v318_v18 = vld [vmem:[%s1072_s4 + $0x38] sm:$0xff]  ;;  %v317_v19 = vld [vmem:[%s1072_s4 + $0x30] sm:$0xff]  ;;  %s604_s21 = sshll.u32 %s816_s20, 4  ;;  %s605_s21 = int_to_ptr.vmem [resolvable:$true] %s604_s21 }
  0x12   :  { %702 = vmatprep.subr.msk.mxu0 %vm101_vm0, %v40_v11  ;;  %v37_v20 = vld [vmem:[%s1068_s0 + $0x40] sm:$0xff]  ;;  %v316_v21 = vld [vmem:[%s1072_s4 + $0x28] sm:$0xff]  ;;  %v36_v23 = vld [vmem:[%s1068_s0 + $0x38] sm:$0xff]  ;;  %p796_p1 = scmp.lt.s32.totalorder %s605_s21, %s605_s21 }
  0x13   :  { %v315_v22 = vld [vmem:[%s1072_s4 + $0x20] sm:$0xff]  ;;  %v314_v24 = vld [vmem:[%s1072_s4 + $0x18] sm:$0xff]  ;;  %v313_v25 = vld [vmem:[%s1072_s4 + $0x10] sm:$0xff] }
  0x14   :  { %68 = vperm.xlu0 %789, %v54_v15   ;;  %63 = vperm.xlu1 %790, %v53_v16   ;;  %v35_v26 = vld [vmem:[%s1068_s0 + $0x30] sm:$0xff]  ;;  %v312_v27 = vld [vmem:[%s1072_s4 + $0x8] sm:$0xff]  ;;  %v311_v28 = vld [vmem:[%s1072_s4] sm:$0xff] }
  0x15   :  { %703 = vmatpush3.xpose.msk.msra.mxu0 %vm101_vm0, %v40_v11  ;;  %v34_v29 = vld [vmem:[%s1068_s0 + $0x28] sm:$0xff]  ;;  %v514_v30 = vld [vmem:[#allocation2] sm:$0x1]  ;;  %v32_v32 = vld [vmem:[%s1068_s0 + $0x18] sm:$0xff] }
  0x16   :  { %704 = vmatprep.subr.msk.mxu0 %vm101_vm0, %v39_v14  ;;  %v33_v31 = vld [vmem:[%s1068_s0 + $0x20] sm:$0xff]  ;;  %v31_v33 = vld [vmem:[%s1068_s0 + $0x10] sm:$0xff]  ;;  %v30_v34 = vld [vmem:[%s1068_s0 + $0x8] sm:$0xff] }
  0x17   :  { %v29_v35 = vld [vmem:[%s1068_s0] sm:$0xff]  ;;  %v46_v36 = vld [vmem:[%s1069_s1 + $0x8] sm:$0xff]  ;;  %v47_v37 = vld [vmem:[%s1069_s1 + $0x10] sm:$0xff]  ;;  %s791_s0 = scalar_lea.vmem %s605_s21, 16 }
  0x18   :  { %356 = vperm.xlu0 %789, %v318_v18   ;;  %351 = vperm.xlu1 %790, %v317_v19   ;;  %v48_v38 = vld [vmem:[%s1069_s1 + $0x18] sm:$0xff]  ;;  %v49_v39 = vld [vmem:[%s1069_s1 + $0x20] sm:$0xff]  ;;  %v50_v40 = vld [vmem:[%s1069_s1 + $0x28] sm:$0xff]  ;;  %p792_p0 = scmp.ne.s32.totalorder %s605_s21, %s791_s0 }
  0x19   :  { %705 = vmatpush3.xpose.msk.msra.mxu0 %vm101_vm0, %v39_v14  ;;  %v51_v41 = vld [vmem:[%s1069_s1 + $0x30] sm:$0xff]  ;;  %v52_v42 = vld [vmem:[%s1069_s1 + $0x38] sm:$0xff]  ;;  %v303_v43 = vld [vmem:[%s1071_s3] sm:$0xff] }
  0x1a   :  { %706 = vmatprep.subr.msk.mxu0 %vm101_vm0, %v38_v17  ;;  %754 = vmatprep.mubr.msk.f32.mxu1 %vm359_vm1, %v303_v43 }
  0x1c   :  { %346 = vperm.xlu0 %789, %v316_v21   ;;  %341 = vperm.xlu1 %790, %v315_v22   ;;  %v305_v21 = vld [vmem:[%s1071_s3 + $0x10] sm:$0xff]  ;;  %v306_v22 = vld [vmem:[%s1071_s3 + $0x18] sm:$0xff] }
  0x1d   :  { %707 = vmatpush3.xpose.msk.msra.mxu0 %vm101_vm0, %v38_v17 }
  0x1e   :  { %708 = vmatprep.subr.msk.mxu0 %vm101_vm0, %v37_v20 }
  0x20   :  { %336 = vperm.xlu0 %789, %v314_v24   ;;  %331 = vperm.xlu1 %790, %v313_v25   ;;  %v308_v24 = vld [vmem:[%s1071_s3 + $0x28] sm:$0xff]  ;;  %v309_v25 = vld [vmem:[%s1071_s3 + $0x30] sm:$0xff] }
  0x21   :  { %709 = vmatpush3.xpose.msk.msra.mxu0 %vm101_vm0, %v37_v20  ;;  %v304_v20 = vld [vmem:[%s1071_s3 + $0x8] sm:$0xff] }
  0x22   :  { %710 = vmatprep.subr.msk.mxu0 %vm101_vm0, %v36_v23 }
  0x24   :  { %326 = vperm.xlu0 %789, %v312_v27   ;;  %321 = vperm.xlu1 %790, %v311_v28   ;;  %v814_v27 = vmov 0.0  }
  0x25   :  { %711 = vmatpush3.xpose.msk.msra.mxu0 %vm101_vm0, %v36_v23  ;;  %v307_v23 = vld [vmem:[%s1071_s3 + $0x20] sm:$0xff] }
  0x26   :  { %712 = vmatprep.subr.msk.mxu0 %vm101_vm0, %v35_v26 }
  0x28   :  { %517 = vperm.xlu0 %789, %v514_v30  }
  0x29   :  { %713 = vmatpush3.xpose.msk.msra.mxu0 %vm101_vm0, %v35_v26  ;;  %v310_v26 = vld [vmem:[%s1071_s3 + $0x38] sm:$0xff] }
  0x2a   :  { %714 = vmatprep.subr.msk.mxu0 %vm101_vm0, %v34_v29 }
  0x2d   :  { %715 = vmatpush3.xpose.msk.msra.mxu0 %vm101_vm0, %v34_v29 }
  0x2e   :  { %716 = vmatprep.subr.msk.mxu0 %vm101_vm0, %v33_v31 }
  0x31   :  { %717 = vmatpush3.xpose.msk.msra.mxu0 %vm101_vm0, %v33_v31 }
  0x32   :  { %718 = vmatprep.subr.msk.mxu0 %vm101_vm0, %v32_v32 }
  0x35   :  { %719 = vmatpush3.xpose.msk.msra.mxu0 %vm101_vm0, %v32_v32 }
  0x36   :  { %720 = vmatprep.subr.msk.mxu0 %vm101_vm0, %v31_v33 }
  0x39   :  { %721 = vmatpush3.xpose.msk.msra.mxu0 %vm101_vm0, %v31_v33 }
  0x3a   :  { %722 = vmatprep.subr.msk.mxu0 %vm101_vm0, %v30_v34 }
  0x3d   :  { %723 = vmatpush3.xpose.msk.msra.mxu0 %vm101_vm0, %v30_v34 }
  0x3e   :  { %724 = vmatprep.subr.msk.mxu0 %vm101_vm0, %v29_v35 }
  0x41   :  { %725 = vmatpush3.xpose.msk.msra.mxu0 %vm101_vm0, %v29_v35 }
  0x44   :  { %727 = vmatmul.mubr.msk.f32.vlgmr.msra.gmra.mxu0 %vm101_vm0, %v46_v36 }
  0x45   :  { %729 = vmatprep.mubr.msk.f32.mxu0 %vm101_vm0, %v47_v37 }
  0x48   :  { %730 = vmatmul.mubr.msk.f32.gmra.mxu0 %vm101_vm0, %v48_v38 }
  0x49   :  { %732 = vmatprep.mubr.msk.f32.mxu0 %vm101_vm0, %v49_v39 }
  0x4c   :  { %733 = vmatmul.mubr.msk.f32.gmra.mxu0 %vm101_vm0, %v50_v40 }
  0x4d   :  { %735 = vmatprep.mubr.msk.f32.mxu0 %vm101_vm0, %v51_v41 }
  0x50   :  { %736 = vmatmul.mubr.msk.f32.gmra.mxu0 %vm101_vm0, %v52_v42 }
  0x82   :  { %v99_v45 = vpop.permute.xlu0 %98  ;;  %v89_v47 = vpop.permute.xlu1 %88 }
  0x86   :  { %v94_v50 = vpop.permute.xlu0 %93  ;;  %v84_v52 = vpop.permute.xlu1 %83 }
  0x8b   :  { %v79_v57 = vpop.permute.xlu0 %78  ;;  %v74_v62 = vpop.permute.xlu1 %73 }
  0x8f   :  { %v69_v6 = vpop.permute.xlu0 %68  ;;  %v64_v10 = vpop.permute.xlu1 %63 }
  0x93   :  { %v357_v29 = vpop.permute.xlu0 %356  ;;  %v352_v31 = vpop.permute.xlu1 %351 }
  0x97   :  { %v347_v34 = vpop.permute.xlu0 %346  ;;  %v342_v36 = vpop.permute.xlu1 %341 }
  0x9b   :  { %v337_v41 = vpop.permute.xlu0 %336 }
 0x104   :  { %v728_v44 = vpop.f32.mrf.mxu0 }
 0x105   :  { %v246_v7 = vadd.f32 %v728_v44, %v69_v6 }
 0x106   :  { %v240_v46 = vpop.f32.mrf.mxu0 }
 0x107   :  { %v241_v11 = vadd.f32 %v240_v46, %v64_v10  ;;  %v288_v14 = vmul.f32 0.01, %v246_v7  ;;  %vm280_vm8 = vcmp.gt.f32.partialorder %v246_v7, 0.0  ;;  %v332_v46 = vpop.permute.xlu1 %331 }
 0x108   :  { %v731_v48 = vpop.f32.mrf.mxu0 }
 0x109   :  { %v256_v63 = vadd.f32 %v731_v48, %v79_v57  ;;  %v287_v16 = vmul.f32 0.01, %v241_v11  ;;  %vm279_vm9 = vcmp.gt.f32.partialorder %v241_v11, 0.0  ;;  %v296_v18 = vsel %vm280_vm8, %v246_v7, %v288_v14 }
 0x10a   :  { %v250_v49 = vpop.f32.mrf.mxu0 }
 0x10b   :  { %v251_v3 = vadd.f32 %v250_v49, %v74_v62  ;;  %v290_v8 = vmul.f32 0.01, %v256_v63  ;;  %vm282_vm6 = vcmp.gt.f32.partialorder %v256_v63, 0.0  ;;  %v295_v19 = vsel %vm279_vm9, %v241_v11, %v287_v16 }
 0x10c   :  { %v734_v51 = vpop.f32.mrf.mxu0 }
 0x10d   :  { %v266_v55 = vadd.f32 %v734_v51, %v89_v47  ;;  %v289_v12 = vmul.f32 0.01, %v251_v3  ;;  %vm281_vm7 = vcmp.gt.f32.partialorder %v251_v3, 0.0  ;;  %v298_v15 = vsel %vm282_vm6, %v256_v63, %v290_v8 }
 0x10e   :  { %v260_v53 = vpop.f32.mrf.mxu0 }
 0x10f   :  { %v261_v59 = vadd.f32 %v260_v53, %v84_v52  ;;  %v292_v0 = vmul.f32 0.01, %v266_v55  ;;  %vm284_vm4 = vcmp.gt.f32.partialorder %v266_v55, 0.0  ;;  %v297_v17 = vsel %vm281_vm7, %v251_v3, %v289_v12  ;;  %v513_v3 = vld [vmem:[%s1073_s5] sm:$0x1]  ;;  %s795_s5 = scalar_lea.vmem %s605_s21, 32 }
 0x110   :  { %v737_v54 = vpop.f32.mrf.mxu0  ;;  %p797_p2 = scmp.lt.s32.totalorder %s795_s5, %s791_s0 }
 0x111   :  { %v276_v56 = vadd.f32 %v737_v54, %v99_v45  ;;  %v291_v4 = vmul.f32 0.01, %v261_v59  ;;  %vm283_vm5 = vcmp.gt.f32.partialorder %v261_v59, 0.0  ;;  %v300_v9 = vsel %vm284_vm4, %v266_v55, %v292_v0  ;;  %v327_v54 = vpop.permute.xlu0 %326 }
 0x112   :  { %v270_v58 = vpop.f32.mrf.mxu0  ;;  %p798_p3 = por %p797_p2, %p796_p1 }
 0x113   :  { %v271_v60 = vadd.f32 %v270_v58, %v94_v50  ;;  %vm286_vm2 = vcmp.gt.f32.partialorder %v276_v56, 0.0  ;;  %v294_v61 = vmul.f32 0.01, %v276_v56  ;;  %v299_v13 = vsel %vm283_vm5, %v261_v59, %v291_v4  ;;  %v322_v58 = vpop.permute.xlu1 %321 }
 0x114   :  { %p799_p4 = pnand %p798_p3, %p792_p0 }
 0x115   :  { %v293_v1 = vmul.f32 0.01, %v271_v60  ;;  %v302_v2 = vsel %vm286_vm2, %v276_v56, %v294_v61  ;;  %vm285_vm3 = vcmp.gt.f32.partialorder %v271_v60, 0.0  ;;  %v518_v8 = vpop.permute.xlu0 %517 }
 0x116   :  { %738 = vmatprep.subr.mxu1 %v302_v2 }
 0x117   :  { %739 = vmatpush3.msra.mxu1 %v302_v2  ;;  %v301_v5 = vsel %vm285_vm3, %v271_v60, %v293_v1 }
 0x118   :  { %740 = vmatprep.subr.mxu1 %v301_v5 }
 0x119   :  { %741 = vmatpush3.msra.mxu1 %v301_v5  ;;  %v520_v5 = vlaneseq }
 0x11a   :  { %742 = vmatprep.subr.mxu1 %v300_v9 }
 0x11b   :  { %743 = vmatpush3.msra.mxu1 %v300_v9  ;;  %v521_v6 = vshrl.u32 %v520_v5, 7 }
 0x11c   :  { %744 = vmatprep.subr.mxu1 %v299_v13 }
 0x11d   :  { %745 = vmatpush3.msra.mxu1 %v299_v13  ;;  %v522_v7 = vsub.s32 0, %v521_v6 }
 0x11e   :  { %746 = vmatprep.subr.mxu1 %v298_v15 }
 0x11f   :  { %747 = vmatpush3.msra.mxu1 %v298_v15  ;;  %v523_v9 = vrot.slane %v518_v8, %v522_v7 }
 0x120   :  { %748 = vmatprep.subr.mxu1 %v297_v17 }
 0x121   :  { %749 = vmatpush3.msra.mxu1 %v297_v17 }
 0x122   :  { %750 = vmatprep.subr.mxu1 %v296_v18 }
 0x123   :  { %751 = vmatpush3.msra.mxu1 %v296_v18 }
 0x124   :  { %752 = vmatprep.subr.mxu1 %v295_v19 }
 0x125   :  { %753 = vmatpush3.msra.mxu1 %v295_v19 }
 0x126   :  { %755 = vmatmul.mubr.msk.f32.vlgmr.msra.gmra.mxu1 %vm359_vm1, %v304_v20  ;;  %766 = vmatprep.subr.mxu1 %v814_v27 }
 0x127   :  { %757 = vmatprep.mubr.msk.f32.mxu1 %vm359_vm1, %v305_v21 }
 0x12a   :  { %758 = vmatmul.mubr.msk.f32.gmra.mxu1 %vm359_vm1, %v306_v22 }
 0x12b   :  { %760 = vmatprep.mubr.msk.f32.mxu1 %vm359_vm1, %v307_v23 }
 0x12e   :  { %761 = vmatmul.mubr.msk.f32.gmra.mxu1 %vm359_vm1, %v308_v24 }
 0x12f   :  { %763 = vmatprep.mubr.msk.f32.mxu1 %vm359_vm1, %v309_v25 }
 0x132   :  { %764 = vmatmul.mubr.msk.f32.gmra.mxu1 %vm359_vm1, %v310_v26 }
 0x133   :  { %782 = vmatprep.mubr.msk.f32.mxu1 %vm815_vm10, %v814_v27 }
 0x1e6   :  { %v756_v28 = vpop.f32.mrf.mxu1 }
 0x1e7   :  { %v456_v55 = vadd.f32 %v756_v28, %v327_v54 }
 0x1e8   :  { %v450_v30 = vpop.f32.mrf.mxu1 }
 0x1e9   :  { %v451_v59 = vadd.f32 %v450_v30, %v322_v58  ;;  %v498_v62 = vmul.f32 0.01, %v456_v55  ;;  %vm490_vm2 = vcmp.gt.f32.partialorder %v456_v55, 0.0 }
 0x1ea   :  { %v759_v32 = vpop.f32.mrf.mxu1 }
 0x1eb   :  { %v466_v47 = vadd.f32 %v759_v32, %v337_v41  ;;  %v497_v0 = vmul.f32 0.01, %v451_v59  ;;  %vm489_vm3 = vcmp.gt.f32.partialorder %v451_v59, 0.0  ;;  %v506_v2 = vsel %vm490_vm2, %v456_v55, %v498_v62 }
 0x1ec   :  { %v460_v33 = vpop.f32.mrf.mxu1 }
 0x1ed   :  { %v461_v51 = vadd.f32 %v460_v33, %v332_v46  ;;  %v500_v56 = vmul.f32 0.01, %v466_v47  ;;  %vm492_vm15 = vcmp.gt.f32.partialorder %v466_v47, 0.0  ;;  %v505_v4 = vsel %vm489_vm3, %v451_v59, %v497_v0 }
 0x1ee   :  { %v762_v35 = vpop.f32.mrf.mxu1 }
 0x1ef   :  { %v476_v39 = vadd.f32 %v762_v35, %v347_v34  ;;  %v499_v60 = vmul.f32 0.01, %v461_v51  ;;  %vm491_vm0 = vcmp.gt.f32.partialorder %v461_v51, 0.0  ;;  %v508_v63 = vsel %vm492_vm15, %v466_v47, %v500_v56 }
 0x1f0   :  { %v470_v37 = vpop.f32.mrf.mxu1 }
 0x1f1   :  { %v471_v43 = vadd.f32 %v470_v37, %v342_v36  ;;  %v502_v48 = vmul.f32 0.01, %v476_v39  ;;  %vm494_vm13 = vcmp.gt.f32.partialorder %v476_v39, 0.0  ;;  %v507_v1 = vsel %vm491_vm0, %v461_v51, %v499_v60 }
 0x1f2   :  { %v765_v38 = vpop.f32.mrf.mxu1 }
 0x1f3   :  { %v486_v40 = vadd.f32 %v765_v38, %v357_v29  ;;  %v501_v52 = vmul.f32 0.01, %v471_v43  ;;  %vm493_vm14 = vcmp.gt.f32.partialorder %v471_v43, 0.0  ;;  %v510_v57 = vsel %vm494_vm13, %v476_v39, %v502_v48 }
 0x1f4   :  { %v480_v42 = vpop.f32.mrf.mxu1 }
 0x1f5   :  { %vm496_vm11 = vcmp.gt.f32.partialorder %v486_v40, 0.0  ;;  %v504_v44 = vmul.f32 0.01, %v486_v40  ;;  %v481_v45 = vadd.f32 %v480_v42, %v352_v31  ;;  %v509_v61 = vsel %vm493_vm14, %v471_v43, %v501_v52 }
 0x1f7   :  { %vm495_vm12 = vcmp.gt.f32.partialorder %v481_v45, 0.0  ;;  %v503_v49 = vmul.f32 0.01, %v481_v45  ;;  %v512_v50 = vsel %vm496_vm11, %v486_v40, %v504_v44 }
 0x1f8   :  { %767 = vmatpush3.msra.mxu1 %v512_v50 }
 0x1f9   :  { %768 = vmatprep.subr.mxu1 %v814_v27  ;;  %v511_v53 = vsel %vm495_vm12, %v481_v45, %v503_v49 }
 0x1fa   :  { %769 = vmatpush3.msra.mxu1 %v511_v53 }
 0x1fb   :  { %770 = vmatprep.subr.mxu1 %v814_v27 }
 0x1fc   :  { %771 = vmatpush3.msra.mxu1 %v510_v57 }
 0x1fd   :  { %772 = vmatprep.subr.mxu1 %v814_v27 }
 0x1fe   :  { %773 = vmatpush3.msra.mxu1 %v509_v61 }
 0x1ff   :  { %774 = vmatprep.subr.mxu1 %v814_v27 }
 0x200   :  { %775 = vmatpush3.msra.mxu1 %v508_v63 }
 0x201   :  { %776 = vmatprep.subr.mxu1 %v814_v27 }
 0x202   :  { %777 = vmatpush3.msra.mxu1 %v507_v1 }
 0x203   :  { %778 = vmatprep.subr.mxu1 %v814_v27 }
 0x204   :  { %779 = vmatpush3.msra.mxu1 %v506_v2 }
 0x205   :  { %780 = vmatprep.subr.mxu1 %v814_v27 }
 0x206   :  { %781 = vmatpush3.msra.mxu1 %v505_v4 }
 0x207   :  { %783 = vmatmul.mubr.msk.f32.vlgmr.msra.gmra.mxu1 %vm359_vm1, %v513_v3 }
 0x2c7   :  { %v593_v10 = vpop.f32.mrf.mxu1 }
 0x2c8   :  { %v594_v11 = vadd.f32 %v593_v10, %v523_v9 }
 0x2c9   :  { %v784_v12 = vpop.f32.mrf.mxu1 }
 0x2ca   :  { %597 = vst [vmem:[#allocation3] sm:$0x1] %v594_v11 }
 0x2cb   :  { %802 = shalt.err (!%p799_p4)
}
 0x2cc   :  { %607 = dma.vmem_to_hbm [thread:$0]  %s605_s21, 16, %s1075_s7, [#allocation4]  }
 0x2cd   :  { %811 = dma.done.wait [#allocation4], 16  }
 0x2ce   :  { %812 = vsyncadd [#allocation4], 4294967280 }
 0x2cf   :  { %611 = vsyncpa [#allocation4], 1 }

</bundles_post_ra>
